<compile_context>
chip_gen: v7x
topology: tpu7x:2x2x1
jax: 0.10.0
libtpu: 0.0.40
codegen_flags: <defaults>
</compile_context>

<pallas_src>
from functools import partial

import jax
import jax.numpy as jnp
from jax.experimental import pallas as pl
from jax.experimental.pallas import tpu as pltpu

_MIB = 1024 * 1024


# ---------------------------------------------------------------------------
# Activations (match torch.nn defaults)
# ---------------------------------------------------------------------------
_ACTIVATIONS = {
    "ReLU": lambda x: jnp.maximum(x, 0.0),
    "Tanh": jnp.tanh,
    "Sigmoid": jax.nn.sigmoid,
    # torch.nn.GELU default is the exact erf form, not the tanh approximation.
    "GELU": partial(jax.nn.gelu, approximate=False),
    "SiLU": jax.nn.silu,
    "ELU": jax.nn.elu,
    "LeakyReLU": lambda x: jax.nn.leaky_relu(x, 0.01),
    "Softplus": jax.nn.softplus,
}


# ---------------------------------------------------------------------------
# Small helpers
# ---------------------------------------------------------------------------
def _round_up(n, m):
    return ((n + m - 1) // m) * m


def _cdiv(a, b):
    return (a + b - 1) // b


def _sublane(dtype):
    """Minimum sublane multiple for a packed vreg tile of this dtype."""
    return max(8, 32 // jnp.dtype(dtype).itemsize)


def _vmem_capacity_bytes():
    """Per-TensorCore VMEM capacity, clamped to a sane range."""
    cap = 64 * _MIB  # conservative fallback (v7x per-TC)
    try:
        cap = int(pltpu.get_tpu_info().vmem_capacity_bytes)
    except Exception:
        pass
    try:
        kind = jax.devices()[0].device_kind.lower()
        if "v7" in kind or "7x" in kind:
            cap = min(cap, 64 * _MIB)  # v7x is 64 MiB per TC
    except Exception:
        pass
    return max(32 * _MIB, min(cap, 128 * _MIB))


def _num_tensorcores():
    """TensorCores one pallas grid can feed (megacore v4/v5p, dual-TC v7x)."""
    try:
        kind = jax.devices()[0].device_kind.lower()
    except Exception:
        return 1
    if "lite" in kind or "v5e" in kind or "v6e" in kind:
        return 1
    if any(t in kind for t in ("v4", "v5p", "v7", "7x")):
        return 2
    return 1


# ---------------------------------------------------------------------------
# Fused-MLP kernel (resident weights): grid tiles the batch dimension only;
# all weights/biases are whole-array VMEM residents (single copy, no
# double-buffering), biases already f32.
# ---------------------------------------------------------------------------
def _make_fused_mlp_kernel(num_layers, hidden_act, final_act):
    def kernel(*refs):
        x_ref = refs[0]
        o_ref = refs[-1]
        param_refs = refs[1:-1]  # interleaved (w0, b0, w1, b1, ...)

        h = x_ref[...]
        for layer in range(num_layers):
            w = param_refs[2 * layer][...]        # (in, out), compute dtype
            b = param_refs[2 * layer + 1][...]    # (1, out), f32 (pre-cast)
            lhs = h if h.dtype == w.dtype else h.astype(w.dtype)
            acc = jnp.dot(lhs, w, preferred_element_type=jnp.float32) + b
            if layer < num_layers - 1:
                h = hidden_act(acc)
            elif final_act is not None:
                h = final_act(acc)
            else:
                h = acc
        o_ref[...] = h.astype(o_ref.dtype)

    return kernel


# ---------------------------------------------------------------------------
# Streaming fallback: one fused (matmul + bias + activation) kernel per layer,
# weights tiled over an (M, N, K) grid and double-buffered by BlockSpec.
# Used when the parameters do not fit in ~half the VMEM budget.
# ---------------------------------------------------------------------------
def _make_linear_act_kernel(act):
    def kernel(x_ref, w_ref, b_ref, o_ref, acc_ref):
        @pl.when(pl.program_id(2) == 0)
        def _init():
            acc_ref[...] = jnp.zeros_like(acc_ref)

        acc_ref[...] += jnp.dot(x_ref[...], w_ref[...],
                                preferred_element_type=jnp.float32)

        @pl.when(pl.program_id(2) == pl.num_programs(2) - 1)
        def _finish():
            r = acc_ref[...] + b_ref[...]
            if act is not None:
                r = act(r)
            o_ref[...] = r.astype(o_ref.dtype)

    return kernel


def _linear_act_streamed(x, w, b_f32, act, out_dtype, *, vmem_limit_bytes):
    M, K = x.shape
    N = w.shape[1]

    # Reduction (K) tiles must cover K exactly (a ragged K block would
    # accumulate garbage); pick the largest nice divisor, else the full K.
    tk = K
    for cand in (2048, 1024, 512, 256, 128):
        if K > cand and K % cand == 0:
            tk = cand
            break
    # Ragged M / N blocks are safe: out-of-bounds rows/cols are dropped on the
    # masked output store.
    tm = M if M <= 512 else 512
    tn = N if N <= 512 else 512

    grid = (_cdiv(M, tm), _cdiv(N, tn), _cdiv(K, tk))
    kernel = _make_linear_act_kernel(act)

    return pl.pallas_call(
        kernel,
        out_shape=jax.ShapeDtypeStruct((M, N), out_dtype),
        grid_spec=pltpu.PrefetchScalarGridSpec(
            num_scalar_prefetch=0,
            grid=grid,
            in_specs=[
                pl.BlockSpec((tm, tk), lambda i, j, k: (i, k)),
                pl.BlockSpec((tk, tn), lambda i, j, k: (k, j)),
                pl.BlockSpec((1, tn), lambda i, j, k: (0, j)),
            ],
            out_specs=pl.BlockSpec((tm, tn), lambda i, j, k: (i, j)),
            scratch_shapes=[pltpu.VMEM((tm, tn), jnp.float32)],
        ),
        compiler_params=pltpu.CompilerParams(
            dimension_semantics=("parallel", "parallel", "arbitrary"),
            vmem_limit_bytes=vmem_limit_bytes,
        ),
    )(x, w, b_f32)


# ---------------------------------------------------------------------------
# Wrapper: mirrors FeedForwardNetwork.forward.
# params = [(W_in_out, b_out), ...] with W already in (in, out) layout
# (== torch weight.T).
# ---------------------------------------------------------------------------
def feed_forward_network(x, params, activation_function="ReLU",
                         final_activation=None, *, block_batch=None,
                         compute_dtype=None, input_buffers=None,
                         max_resident_param_bytes=None):
    num_layers = len(params)
    in_dim = x.shape[-1]
    out_dim = params[-1][0].shape[1]
    assert params[0][0].shape[0] == in_dim

    hidden_act = _ACTIVATIONS[activation_function]
    final_act = _ACTIVATIONS[final_activation] if final_activation else None

    # torch.nn.Linear accepts (..., in_features): flatten leading dims
    # (contiguous reshape -> effectively free).
    orig_lead = x.shape[:-1]
    x2 = x.reshape(-1, in_dim)
    batch = x2.shape[0]

    # Optional bf16 (or other) compute path: cast weights ONCE in the wrapper;
    # the x tile is cast in-kernel; accumulation stays f32.
    if compute_dtype is not None:
        ws = [w.astype(compute_dtype) for (w, _) in params]
    else:
        ws = [w for (w, _) in params]
    # Biases pre-cast to f32 (1, out): no per-grid-step cast in the kernel.
    bs = [b.reshape(1, -1).astype(jnp.float32) for (_, b) in params]

    param_bytes = sum(w.size * w.dtype.itemsize for w in ws) \
        + sum(b.size * b.dtype.itemsize for b in bs)

    # ---- per-generation VMEM sizing ---------------------------------------
    cap = _vmem_capacity_bytes()
    vmem_budget = (cap * 3) // 4      # ~96 MiB on 128 MiB parts, ~48 MiB on v7x
    vmem_limit = (cap * 7) // 8       # explicit limit above the scoped default

    # ---- weight-streaming fallback when params can't stay VMEM-resident ----
    resident_cap = (vmem_budget // 2 if max_resident_param_bytes is None
                    else int(max_resident_param_bytes))
    if param_bytes > resident_cap:
        # TODO(synk): a fully fused streamed pipeline (pltpu.emit_pipeline over
        # hidden tiles) would avoid the HBM round-trip of intermediate
        # activations between layers.
        h = x2 if compute_dtype is None else x2.astype(compute_dtype)
        for i, (w, b) in enumerate(zip(ws, bs)):
            last = (i == num_layers - 1)
            act = final_act if last else hidden_act
            odt = x.dtype if last else h.dtype
            h = _linear_act_streamed(h, w, b, act, odt,
                                     vmem_limit_bytes=vmem_limit)
        return h.reshape(*orig_lead, out_dim)

    # ---- fused path: batch-only grid, weights resident in VMEM -------------
    xb = jnp.dtype(x.dtype).itemsize
    cb = jnp.dtype(ws[0].dtype).itemsize
    sub = _sublane(x2.dtype)
    dims = [in_dim] + [w.shape[1] for w in ws]
    max_dim = max(dims)

    # per-row VMEM estimate: double-buffered x/out tiles + f32 intermediates
    # (two live max-width layers) + compute-dtype copies; 25% headroom.
    per_row = (2 * (in_dim + out_dim) * xb
               + 2 * 4 * max_dim
               + cb * (in_dim + max_dim))
    per_row = int(per_row * 1.25) + 1

    batch_r = _round_up(batch, sub)
    num_tc = _num_tensorcores()

    if block_batch is not None:
        bb = int(block_batch)
    else:
        avail = max(vmem_budget - param_bytes, sub * per_row)
        bb = min(8192, batch_r, max(sub, (avail // per_row) // sub * sub))
        # Feed both TensorCores with a *balanced* even grid (v4/v5p/v7x only).
        if num_tc >= 2 and batch_r >= num_tc * sub:
            nsteps = _round_up(_cdiv(batch_r, bb), num_tc)
            bb = min(bb, _round_up(_cdiv(batch_r, nsteps), sub))
    if bb >= batch:
        bb = batch                       # single full-extent block, grid=(1,)
    else:
        bb = max(sub, _round_up(bb, sub))
    grid = (_cdiv(batch, bb),)           # ragged last block: OOB rows dropped

    # x / out tiled over batch only; last block dim == full feature dim, so no
    # feature padding and no wrapper pad/slice HBM round-trips. Weights and
    # biases are whole-array VMEM residents (single copy, DMA'd once).
    x_spec_kwargs = {}
    if input_buffers is not None:
        x_spec_kwargs["pipeline_mode"] = pl.Buffered(int(input_buffers))
    in_specs = [pl.BlockSpec((bb, in_dim), lambda i: (i, 0), **x_spec_kwargs)]
    flat_params = []
    for w, b in zip(ws, bs):
        flat_params += [w, b]
        in_specs += [pl.BlockSpec(memory_space=pltpu.MemorySpace.VMEM),
                     pl.BlockSpec(memory_space=pltpu.MemorySpace.VMEM)]
    out_spec = pl.BlockSpec((bb, out_dim), lambda i: (i, 0))

    kernel = _make_fused_mlp_kernel(num_layers, hidden_act, final_act)

    y = pl.pallas_call(
        kernel,
        out_shape=jax.ShapeDtypeStruct((batch, out_dim), x.dtype),
        grid_spec=pltpu.PrefetchScalarGridSpec(
            num_scalar_prefetch=0,
            grid=grid,
            in_specs=in_specs,
            out_specs=out_spec,
        ),
        compiler_params=pltpu.CompilerParams(
            dimension_semantics=("parallel",),
            vmem_limit_bytes=vmem_limit,
        ),
    )(x2, *flat_params)

    return y.reshape(*orig_lead, out_dim)


# ---------------------------------------------------------------------------
# Deterministic parameter init mimicking torch.nn.Linear's default
# (uniform(-1/sqrt(fan_in), 1/sqrt(fan_in)) for both weight and bias).
# ---------------------------------------------------------------------------
def init_ffn_params(key, input_dim, output_dim, architecture):
    dims = [input_dim] + [int(a) for a in (architecture or [])] + [output_dim]
    params = []
    for i in range(len(dims) - 1):
        fan_in, fan_out = dims[i], dims[i + 1]
        key, kw, kb = jax.random.split(key, 3)
        bound = 1.0 / (fan_in ** 0.5)
        # stored directly in (in, out) layout (== torch weight.T)
        w = jax.random.uniform(kw, (fan_in, fan_out), jnp.float32, -bound, bound)
        b = jax.random.uniform(kb, (fan_out,), jnp.float32, -bound, bound)
        params.append((w, b))
    return params


def ffn_reference(x, params, activation_function="ReLU", final_activation=None):
    """Plain-JAX reference of the same forward pass (sanity check)."""
    hidden_act = _ACTIVATIONS[activation_function]
    final_act = _ACTIVATIONS[final_activation] if final_activation else None
    h = x
    n = len(params)
    for i, (w, b) in enumerate(params):
        h = h @ w + b
        if i < n - 1:
            h = hidden_act(h)
        elif final_act is not None:
            h = final_act(h)
    return h


if __name__ == "__main__":
    key = jax.random.PRNGKey(0)

    # FeedForwardNetwork(input_dim=32, output_dim=16, architecture=[64, 64],
    #                    activation_function='ReLU', final_activation=None)
    batch, input_dim, output_dim = 16, 32, 16
    architecture = [64, 64]

    key, kx = jax.random.split(key)
    x = jax.random.normal(kx, (batch, input_dim), jnp.float32)
    params = init_ffn_params(key, input_dim, output_dim, architecture)
    y_ref = ffn_reference(x, params, "ReLU", None)

    # 1) fused path (resident weights)
    y = jax.block_until_ready(
        feed_forward_network(x, params, "ReLU", None))
    assert y.shape == (batch, output_dim)
    assert jnp.allclose(y, y_ref, atol=1e-4, rtol=1e-4)

    # 2) single-Linear path (architecture=None) with a final activation
    key, kx2, kp2 = jax.random.split(key, 3)
    x2 = jax.random.normal(kx2, (8, 24), jnp.float32)
    params2 = init_ffn_params(kp2, 24, 10, None)
    y2 = jax.block_until_ready(
        feed_forward_network(x2, params2, "ReLU", final_activation="Tanh"))
    y2_ref = ffn_reference(x2, params2, "ReLU", "Tanh")
    assert y2.shape == (8, 10)
    assert jnp.allclose(y2, y2_ref, atol=1e-4, rtol=1e-4)

    # 3) ragged batch (batch not a multiple of the block) -> no pad/slice path
    x3 = x[:13]
    y3 = jax.block_until_ready(
        feed_forward_network(x3, params, "ReLU", None, block_batch=8))
    assert y3.shape == (13, output_dim)
    assert jnp.allclose(y3, y_ref[:13], atol=1e-4, rtol=1e-4)

    # 4) weight-streaming fallback (forced on small shapes to exercise it)
    y4 = jax.block_until_ready(
        feed_forward_network(x, params, "ReLU", None,
                             max_resident_param_bytes=0))
    assert y4.shape == (batch, output_dim)
    assert jnp.allclose(y4, y_ref, atol=1e-4, rtol=1e-4)

    # 5) opt-in bf16 compute path (f32 accumulation), looser tolerance
    y5 = jax.block_until_ready(
        feed_forward_network(x, params, "ReLU", None,
                             compute_dtype=jnp.bfloat16))
    assert y5.shape == (batch, output_dim)
    assert jnp.allclose(y5, y_ref, atol=2e-1, rtol=1e-1)

    print("KERNEL_OK")
</pallas_src>

<mosaic_0001>
module attributes {stable_mosaic.version = 11 : i64} {
  func.func @kernel(%arg0: i32, %arg1: memref<16x32xf32, #tpu.memory_space<vmem>>, %arg2: memref<32x64xf32, #tpu.memory_space<vmem>>, %arg3: memref<1x64xf32, #tpu.memory_space<vmem>>, %arg4: memref<64x64xf32, #tpu.memory_space<vmem>>, %arg5: memref<1x64xf32, #tpu.memory_space<vmem>>, %arg6: memref<64x16xf32, #tpu.memory_space<vmem>>, %arg7: memref<1x16xf32, #tpu.memory_space<vmem>>, %arg8: memref<16x16xf32, #tpu.memory_space<vmem>>) attributes {dimension_semantics = [#tpu.dimension_semantics<parallel>], iteration_bounds = array<i64: 1>, scalar_prefetch = 0 : i64, scratch_operands = 0 : i64, tpu.core_type = #tpu.core_type<tc>, window_params = [{transform_indices = @transform_0, window_bounds = array<i64: 16, 32>}, {pipeline_mode = #tpu.pipeline_mode<synchronous>, transform_indices = @transform_1, window_bounds = array<i64: 32, 64>}, {pipeline_mode = #tpu.pipeline_mode<synchronous>, transform_indices = @transform_2, window_bounds = array<i64: 1, 64>}, {pipeline_mode = #tpu.pipeline_mode<synchronous>, transform_indices = @transform_3, window_bounds = array<i64: 64, 64>}, {pipeline_mode = #tpu.pipeline_mode<synchronous>, transform_indices = @transform_4, window_bounds = array<i64: 1, 64>}, {pipeline_mode = #tpu.pipeline_mode<synchronous>, transform_indices = @transform_5, window_bounds = array<i64: 64, 16>}, {pipeline_mode = #tpu.pipeline_mode<synchronous>, transform_indices = @transform_6, window_bounds = array<i64: 1, 16>}, {transform_indices = @transform_7, window_bounds = array<i64: 16, 16>}]} {
    %c0 = arith.constant 0 : index
    %c0_0 = arith.constant 0 : index
    %0 = vector.load %arg1[%c0, %c0_0] : memref<16x32xf32, #tpu.memory_space<vmem>>, vector<16x32xf32>
    %c0_1 = arith.constant 0 : index
    %c0_2 = arith.constant 0 : index
    %1 = vector.load %arg2[%c0_1, %c0_2] : memref<32x64xf32, #tpu.memory_space<vmem>>, vector<32x64xf32>
    %c0_3 = arith.constant 0 : index
    %c0_4 = arith.constant 0 : index
    %2 = vector.load %arg3[%c0_3, %c0_4] : memref<1x64xf32, #tpu.memory_space<vmem>>, vector<1x64xf32>
    %cst = arith.constant dense<0.000000e+00> : vector<16x64xf32>
    %3 = tpu.matmul %0, %1, %cst {dimension_numbers = #tpu.dot_dimension_numbers<[1], [0], [0], [1], [0, 0, 1, 1], [], []>} : vector<16x32xf32>, vector<32x64xf32>, vector<16x64xf32> -> vector<16x64xf32>
    %4 = vector.broadcast %2 : vector<1x64xf32> to vector<16x64xf32>
    %5 = arith.addf %3, %4 : vector<16x64xf32>
    %cst_5 = arith.constant 0.000000e+00 : f32
    %6 = vector.broadcast %cst_5 : f32 to vector<16x64xf32>
    %7 = arith.maximumf %5, %6 : vector<16x64xf32>
    %c0_6 = arith.constant 0 : index
    %c0_7 = arith.constant 0 : index
    %8 = vector.load %arg4[%c0_6, %c0_7] : memref<64x64xf32, #tpu.memory_space<vmem>>, vector<64x64xf32>
    %c0_8 = arith.constant 0 : index
    %c0_9 = arith.constant 0 : index
    %9 = vector.load %arg5[%c0_8, %c0_9] : memref<1x64xf32, #tpu.memory_space<vmem>>, vector<1x64xf32>
    %cst_10 = arith.constant dense<0.000000e+00> : vector<16x64xf32>
    %10 = tpu.matmul %7, %8, %cst_10 {dimension_numbers = #tpu.dot_dimension_numbers<[1], [0], [0], [1], [0, 0, 1, 1], [], []>} : vector<16x64xf32>, vector<64x64xf32>, vector<16x64xf32> -> vector<16x64xf32>
    %11 = vector.broadcast %9 : vector<1x64xf32> to vector<16x64xf32>
    %12 = arith.addf %10, %11 : vector<16x64xf32>
    %cst_11 = arith.constant 0.000000e+00 : f32
    %13 = vector.broadcast %cst_11 : f32 to vector<16x64xf32>
    %14 = arith.maximumf %12, %13 : vector<16x64xf32>
    %c0_12 = arith.constant 0 : index
    %c0_13 = arith.constant 0 : index
    %15 = vector.load %arg6[%c0_12, %c0_13] : memref<64x16xf32, #tpu.memory_space<vmem>>, vector<64x16xf32>
    %c0_14 = arith.constant 0 : index
    %c0_15 = arith.constant 0 : index
    %16 = vector.load %arg7[%c0_14, %c0_15] : memref<1x16xf32, #tpu.memory_space<vmem>>, vector<1x16xf32>
    %cst_16 = arith.constant dense<0.000000e+00> : vector<16x16xf32>
    %17 = tpu.matmul %14, %15, %cst_16 {dimension_numbers = #tpu.dot_dimension_numbers<[1], [0], [0], [1], [0, 0, 1, 1], [], []>} : vector<16x64xf32>, vector<64x16xf32>, vector<16x16xf32> -> vector<16x16xf32>
    %18 = vector.broadcast %16 : vector<1x16xf32> to vector<16x16xf32>
    %19 = arith.addf %17, %18 : vector<16x16xf32>
    %c0_17 = arith.constant 0 : index
    %c0_18 = arith.constant 0 : index
    %20 = vector.load %arg8[%c0_17, %c0_18] : memref<16x16xf32, #tpu.memory_space<vmem>>, vector<16x16xf32>
    tpu.vector_store %arg8[%c0_17, %c0_18], %19 {strides = array<i32>} : memref<16x16xf32, #tpu.memory_space<vmem>>, vector<16x16xf32>,
    return
  }
  func.func @transform_0(%arg0: i32) -> (i32, i32) {
    %c0_i32 = arith.constant 0 : i32
    %c0_i32_0 = arith.constant 0 : i32
    return %arg0, %c0_i32 : i32, i32
  }
  func.func @transform_1(%arg0: i32) -> (i32, i32) {
    %c0_i32 = arith.constant 0 : i32
    %c0_i32_0 = arith.constant 0 : i32
    %c0_i32_1 = arith.constant 0 : i32
    return %c0_i32, %c0_i32_0 : i32, i32
  }
  func.func @transform_2(%arg0: i32) -> (i32, i32) {
    %c0_i32 = arith.constant 0 : i32
    %c0_i32_0 = arith.constant 0 : i32
    %c0_i32_1 = arith.constant 0 : i32
    return %c0_i32, %c0_i32_0 : i32, i32
  }
  func.func @transform_3(%arg0: i32) -> (i32, i32) {
    %c0_i32 = arith.constant 0 : i32
    %c0_i32_0 = arith.constant 0 : i32
    %c0_i32_1 = arith.constant 0 : i32
    return %c0_i32, %c0_i32_0 : i32, i32
  }
  func.func @transform_4(%arg0: i32) -> (i32, i32) {
    %c0_i32 = arith.constant 0 : i32
    %c0_i32_0 = arith.constant 0 : i32
    %c0_i32_1 = arith.constant 0 : i32
    return %c0_i32, %c0_i32_0 : i32, i32
  }
  func.func @transform_5(%arg0: i32) -> (i32, i32) {
    %c0_i32 = arith.constant 0 : i32
    %c0_i32_0 = arith.constant 0 : i32
    %c0_i32_1 = arith.constant 0 : i32
    return %c0_i32, %c0_i32_0 : i32, i32
  }
  func.func @transform_6(%arg0: i32) -> (i32, i32) {
    %c0_i32 = arith.constant 0 : i32
    %c0_i32_0 = arith.constant 0 : i32
    %c0_i32_1 = arith.constant 0 : i32
    return %c0_i32, %c0_i32_0 : i32, i32
  }
  func.func @transform_7(%arg0: i32) -> (i32, i32) {
    %c0_i32 = arith.constant 0 : i32
    %c0_i32_0 = arith.constant 0 : i32
    return %arg0, %c0_i32 : i32, i32
  }
}

</mosaic_0001>

<bundles_post_ra>
// kernel: tpu_custom_call.1
= control target key start
LH: loop header
LB: loop body
LE: loop exit
PB: predicated region body
PF: predicated region fallthrough
CT: control target
= control target key end

     0   :  { %12 = vsyncpa [#allocation3], 0  ;;  %s672_s0 = inlined_call_operand.vmem [shape: f32[16,32], index: 0, kind: input, shape index: {}]   ;;  %s673_s1 = inlined_call_operand.hbm [shape: f32[32,64], index: 1, kind: input, shape index: {}]   ;;  %s674_s2 = inlined_call_operand.vmem [shape: f32[1,64], index: 2, kind: input, shape index: {}]   ;;  %s675_s3 = inlined_call_operand.vmem [shape: f32[64,64], index: 3, kind: input, shape index: {}]   ;;  %s676_s4 = inlined_call_operand.vmem [shape: f32[1,64], index: 4, kind: input, shape index: {}]   ;;  %s677_s5 = inlined_call_operand.vmem [shape: f32[64,16], index: 5, kind: input, shape index: {}]   ;;  %s678_s6 = inlined_call_operand.vmem [shape: f32[1,16], index: 6, kind: input, shape index: {}]   ;;  %s679_s7 = inlined_call_operand.hbm [shape: f32[16,16], index: 7, kind: output, shape index: {}]  }
   0x1   :  { %13 = vsyncpa [#allocation4], 0  ;;  %s529_s24 = smov [#allocation2]   ;;  %s481_s28 = scalar_lea.hbm %s673_s1, 512 }
   0x2   :  { %s21_s25 = sshll.u32 %s529_s24, 4  ;;  %p482_p0 = scmp.ne.s32.totalorder %s673_s1, %s481_s28  ;;  %s22_s25 = int_to_ptr.vmem [resolvable:$true] %s21_s25 }
   0x3   :  { %p485_p1 = scmp.lt.u32.totalorder %s481_s28, %s673_s1 }
   0x5   :  { %p487_p2 = pnand %p485_p1, %p482_p0 }
   0x7   :  { %490 = shalt.err (!%p487_p2)
}
   0x8   :  { %s491_s10 = scalar_lea.vmem %s22_s25, 512  ;;  %p496_p4 = scmp.lt.s32.totalorder %s22_s25, %s22_s25 }
   0x9   :  { %p492_p3 = scmp.ne.s32.totalorder %s22_s25, %s491_s10  ;;  %p497_p5 = scmp.lt.s32.totalorder %s491_s10, %s491_s10 }
   0xb   :  { %p498_p6 = por %p497_p5, %p496_p4 }
   0xd   :  { %p499_p7 = pnand %p498_p6, %p492_p3 }
   0xf   :  { %502 = shalt.err (!%p499_p7)
}
  0x10   :  { %s530_s11 = smov 128   ;;  %s531_s12 = smov 8  }
  0x11   :  { %27 = dma.hbm_to_vmem [thread:$0]  %s673_s1, 512, %s22_s25, [#allocation3], %s530_s11, %s530_s11, %s531_s12  }
  0x12   :  { %525 = dma.done.wait [#allocation3], 512  }
  0x13   :  { %526 = vsyncadd [#allocation3], 4294966784  ;;  %vm54_vm0 = vcmask 261120   ;;  %v43_v0 = vld [vmem:[#allocation2] sm:$0xff]  ;;  %v44_v1 = vld [vmem:[#allocation2 + $0x8] sm:$0xff]  ;;  %vm153_vm1 = vcmask 523264  }
  0x14   :  { %v45_v2 = vld [vmem:[#allocation2 + $0x10] sm:$0xff]  ;;  %v437_v3 = vpack.c.bf16 %v44_v1, %v43_v0  ;;  %v46_v4 = vld [vmem:[#allocation2 + $0x18] sm:$0xff]  ;;  %v41_v5 = vld [vmem:[%s672_s0] sm:$0xff]  ;;  %vm333_vm2 = vcmask 130048  }
  0x15   :  { %v441_v6 = vpack.c.bf16 %v46_v4, %v45_v2  ;;  %396 = vmatprep.mubr.msk.f32.mxu0 %vm54_vm0, %v41_v5  ;;  %v138_v7 = vld [vmem:[%s675_s3] sm:$0xff]  ;;  %v139_v8 = vld [vmem:[%s675_s3 + $0x8] sm:$0xff]  ;;  %v140_v9 = vld [vmem:[%s675_s3 + $0x10] sm:$0xff] }
  0x16   :  { %438 = vmatprep.subr.bf16.mxu0 %v437_v3  ;;  %v445_v10 = vpack.c.bf16 %v139_v8, %v138_v7  ;;  %v141_v11 = vld [vmem:[%s675_s3 + $0x18] sm:$0xff]  ;;  %v142_v13 = vld [vmem:[%s675_s3 + $0x20] sm:$0xff]  ;;  %v143_v14 = vld [vmem:[%s675_s3 + $0x28] sm:$0xff] }
  0x17   :  { %440 = vmatpush3.bf16.msra.mxu0 %v437_v3  ;;  %v449_v12 = vpack.c.bf16 %v141_v11, %v140_v9  ;;  %v453_v15 = vpack.c.bf16 %v143_v14, %v142_v13  ;;  %v42_v16 = vld [vmem:[%s672_s0 + $0x8] sm:$0xff]  ;;  %v144_v17 = vld [vmem:[%s675_s3 + $0x30] sm:$0xff]  ;;  %v145_v18 = vld [vmem:[%s675_s3 + $0x38] sm:$0xff] }
  0x18   :  { %442 = vmatprep.subr.bf16.mxu0 %v441_v6  ;;  %446 = vmatprep.subr.bf16.mxu1 %v445_v10  ;;  %v457_v19 = vpack.c.bf16 %v145_v18, %v144_v17  ;;  %v237_v20 = vld [vmem:[%s677_s5] sm:$0xff]  ;;  %v238_v21 = vld [vmem:[%s677_s5 + $0x8] sm:$0xff]  ;;  %v239_v22 = vld [vmem:[%s677_s5 + $0x10] sm:$0xff] }
  0x19   :  { %448 = vmatpush3.bf16.msra.mxu1 %v445_v10  ;;  %v461_v23 = vpack.c.bf16 %v238_v21, %v237_v20  ;;  %v240_v24 = vld [vmem:[%s677_s5 + $0x18] sm:$0xff]  ;;  %v241_v26 = vld [vmem:[%s677_s5 + $0x20] sm:$0xff]  ;;  %v242_v27 = vld [vmem:[%s677_s5 + $0x28] sm:$0xff] }
  0x1a   :  { %450 = vmatprep.subr.bf16.mxu1 %v449_v12  ;;  %v465_v25 = vpack.c.bf16 %v240_v24, %v239_v22  ;;  %v469_v28 = vpack.c.bf16 %v242_v27, %v241_v26  ;;  %v353_v29 = vld [vmem:[%s674_s2] ss:$0 sm:$0xff]  ;;  %v243_v36 = vld [vmem:[%s677_s5 + $0x30] sm:$0xff]  ;;  %v244_v37 = vld [vmem:[%s677_s5 + $0x38] sm:$0xff]  ;;  %s532_s5 = smov [#allocation5]  }
  0x1b   :  { %444 = vmatpush3.bf16.msra.mxu0 %v441_v6  ;;  %v473_v38 = vpack.c.bf16 %v244_v37, %v243_v36  ;;  %v356_v39 = vld [vmem:[%s676_s4] ss:$0 sm:$0xff]  ;;  %s341_s8 = sshll.u32 %s532_s5, 4  ;;  %s342_s8 = int_to_ptr.vmem [resolvable:$true] %s341_s8 }
  0x1c   :  { %462 = vmatprep.subr.bf16.mxu0 %v461_v23  ;;  %v359_v46 = vld [vmem:[%s678_s6] ss:$0 sm:$0xff]  ;;  %s503_s4 = scalar_lea.vmem %s342_s8, 256  ;;  %p508_p9 = scmp.lt.s32.totalorder %s342_s8, %s342_s8 }
  0x1d   :  { %452 = vmatpush3.bf16.msra.mxu1 %v449_v12  ;;  %p504_p8 = scmp.ne.s32.totalorder %s342_s8, %s503_s4  ;;  %p509_p10 = scmp.lt.s32.totalorder %s503_s4, %s503_s4 }
  0x1e   :  { %397 = vmatmul.mubr.msk.f32.vlgmr.msra.gmra.mrb[0].mxu0 %vm54_vm0, %v42_v16  ;;  %454 = vmatprep.subr.bf16.mxu1 %v453_v15 }
  0x1f   :  { %464 = vmatpush3.bf16.msra.mxu0 %v461_v23  ;;  %p510_p11 = por %p509_p10, %p508_p9 }
  0x20   :  { %466 = vmatprep.subr.bf16.mxu0 %v465_v25 }
  0x21   :  { %456 = vmatpush3.bf16.msra.mxu1 %v453_v15  ;;  %p511_p12 = pnand %p510_p11, %p504_p8 }
  0x22   :  { %458 = vmatprep.subr.bf16.mxu1 %v457_v19 }
  0x23   :  { %468 = vmatpush3.bf16.msra.mxu0 %v465_v25 }
  0x24   :  { %470 = vmatprep.subr.bf16.mxu0 %v469_v28 }
  0x25   :  { %460 = vmatpush3.bf16.msra.mxu1 %v457_v19 }
  0x27   :  { %472 = vmatpush3.bf16.msra.mxu0 %v469_v28 }
  0x28   :  { %474 = vmatprep.subr.bf16.mxu0 %v473_v38 }
  0x2b   :  { %476 = vmatpush3.bf16.msra.mxu0 %v473_v38 }
  0xf1   :  { %v398_v30 = vpop.f32.mrb[0].mxu0 }
  0xf2   :  { %v133_v31 = vadd.f32 %v398_v30, %v353_v29  ;;  %v127_v32 = vpop.f32.mrb[1].mxu0 }
  0xf3   :  { %v128_v33 = vadd.f32 %v353_v29, %v127_v32 }
  0xf4   :  { %v137_v35 = vmax.f32 %v133_v31, 0.0 }
  0xf5   :  { %v136_v34 = vmax.f32 %v128_v33, 0.0 }
  0xf7   :  { %415 = vmatprep.mubr.msk.f32.mxu1 %vm153_vm1, %v136_v34 }
  0xf8   :  { %416 = vmatmul.mubr.msk.f32.vlgmr.msra.gmra.mrb[0].mxu1 %vm153_vm1, %v137_v35 }
 0x1cb   :  { %v417_v40 = vpop.f32.mrb[0].mxu1 }
 0x1cc   :  { %v232_v41 = vadd.f32 %v417_v40, %v356_v39  ;;  %v226_v42 = vpop.f32.mrb[1].mxu1 }
 0x1cd   :  { %v227_v43 = vadd.f32 %v356_v39, %v226_v42 }
 0x1ce   :  { %v236_v45 = vmax.f32 %v232_v41, 0.0 }
 0x1cf   :  { %v235_v44 = vmax.f32 %v227_v43, 0.0 }
 0x1d1   :  { %434 = vmatprep.mubr.msk.f32.mxu0 %vm153_vm1, %v235_v44 }
 0x1d2   :  { %435 = vmatmul.mubr.msk.f32.vlgmr.msra.gmra.mrb[2].mxu0 %vm153_vm1, %v236_v45 }
 0x2a5   :  { %v436_v47 = vpop.f32.mrb[2].mxu0 }
 0x2a6   :  { %v330_v48 = vadd.f32 %v436_v47, %v359_v46  ;;  %v324_v49 = vpop.f32.mrb[3].mxu0 }
 0x2a7   :  { %v325_v50 = vadd.f32 %v359_v46, %v324_v49 }
 0x2a8   :  { %335 = vst.msk [vmem:[#allocation5 + $0x8] sm:$0xff] %vm333_vm2, %v330_v48 }
 0x2a9   :  { %334 = vst.msk [vmem:[#allocation5] sm:$0xff] %vm333_vm2, %v325_v50 }
 0x2aa   :  { %514 = shalt.err (!%p511_p12)
}
 0x2ab   :  { %s515_s6 = scalar_lea.hbm %s679_s7, 256 }
 0x2ac   :  { %p516_p13 = scmp.ne.s32.totalorder %s679_s7, %s515_s6  ;;  %p519_p0 = scmp.lt.u32.totalorder %s515_s6, %s679_s7 }
 0x2ae   :  { %p521_p1 = pnand %p519_p0, %p516_p13 }
 0x2b0   :  { %524 = shalt.err (!%p521_p1)
}
 0x2b1   :  { %347 = dma.vmem_to_hbm [thread:$0]  %s342_s8, 256, %s679_s7, [#allocation4], %s530_s11, %s530_s11, %s531_s12  }
 0x2b2   :  { %527 = dma.done.wait [#allocation4], 256  }
 0x2b3   :  { %528 = vsyncadd [#allocation4], 4294967040 }
 0x2b4   :  { %351 = vsyncpa [#allocation3], 1 }
 0x2b5   :  { %352 = vsyncpa [#allocation4], 1 }

</bundles_post_ra>
